<compile_context>
chip_gen: v6e
topology: v6e:2x2x1
jax: 0.10.0
libtpu: 0.0.40
codegen_flags: <defaults>
</compile_context>

<pallas_src>
import functools

import jax
import jax.numpy as jnp
from jax.experimental import pallas as pl
from jax.experimental.pallas import tpu as pltpu


# ---------------------------------------------------------------------------
# Shared per-tile compute: K accumulating dots + bias + ReLU (all f32 accumulate).
# ---------------------------------------------------------------------------
def _conv_taps(xw, w_all, b_col, ksize, tl):
    """xw: (Cin, TL+K-1) compute dtype; w_all: (K, Cout, Cin); b_col: (Cout, 1) f32.

    Returns ReLU(conv + bias) as (Cout, TL) f32."""
    acc = jnp.dot(w_all[0], xw[:, 0:tl], preferred_element_type=jnp.float32)
    for k in range(1, ksize):
        acc = acc + jnp.dot(w_all[k], xw[:, k:k + tl],
                            preferred_element_type=jnp.float32)
    return jnp.maximum(acc + b_col, 0.0)


# ---------------------------------------------------------------------------
# Path A: resident row(s) in VMEM via BlockSpec (small Cin*L), optional batch fold.
# ---------------------------------------------------------------------------
def _conv_relu_rows_kernel(x_ref, w_ref, b_ref, o_ref, *, ksize, tl, n_lt, bt,
                           compute_dtype):
    # x_ref: (BT, Cin, L) resident rows   w_ref: (K, Cout, Cin)   b_ref: (Cout, 1)
    # o_ref: (BT, Cout, TL)
    if n_lt == 1:
        start = 0                                       # static slice
    else:
        start = pl.multiple_of(pl.program_id(1) * tl, 128)   # TL is a 128-multiple

    w_all = w_ref[...]
    b_col = b_ref[...]
    for r in range(bt):                                 # bt is small & static (<= 8)
        # Cast fused in-kernel: the HBM read stays in the input dtype.
        xw = x_ref[r, :, pl.ds(start, tl + ksize - 1)].astype(compute_dtype)
        o_ref[r] = _conv_taps(xw, w_all, b_col, ksize, tl).astype(o_ref.dtype)


# ---------------------------------------------------------------------------
# Path B: x stays in HBM; manual double-buffered halo-window DMA per L tile.
# ---------------------------------------------------------------------------
def _conv_relu_halo_kernel(x_hbm, w_ref, b_ref, o_ref, xbuf, sem, *, ksize, tl, n_lt,
                           compute_dtype):
    # x_hbm: (B, Cin, L) HBM ref     xbuf: (2, Cin, TL+K-1) VMEM     sem: DMA (2,)
    b = pl.program_id(0)
    lt = pl.program_id(1)
    win = tl + ksize - 1
    slot = lt & 1

    def _fetch(tile_idx, slot_idx):
        start = pl.multiple_of(tile_idx * tl, 128)
        pltpu.make_async_copy(
            x_hbm.at[b, :, pl.ds(start, win)], xbuf.at[slot_idx], sem.at[slot_idx],
        ).start()

    @pl.when(lt == 0)                 # prime the pipeline at the start of each row
    def _():
        _fetch(0, 0)

    # Wait for this tile's window (src slice is shape-only; wait keys off dst + sem).
    pltpu.make_async_copy(
        x_hbm.at[b, :, pl.ds(0, win)], xbuf.at[slot], sem.at[slot],
    ).wait()

    @pl.when(lt + 1 < n_lt)           # prefetch next tile's window of the same row
    def _():
        _fetch(lt + 1, 1 - slot)

    xw = xbuf[slot].astype(compute_dtype)               # cast fused in VMEM
    o_ref[0] = _conv_taps(xw, w_ref[...], b_ref[...], ksize, tl).astype(o_ref.dtype)


# ---------------------------------------------------------------------------
# Tiling heuristics / VMEM budget.
# ---------------------------------------------------------------------------
def _pick_l_tile(l_out, target):
    """Largest 128-multiple tile <= target that divides l_out; else one full tile."""
    if l_out % 128 != 0:
        return l_out
    tl = min(l_out, max(128, target - target % 128))
    tl -= tl % 128
    while l_out % tl:
        tl -= 128
    return tl


def _pick_batch_tile(batch, l_out, n_lt, cin, length, x_itemsize, budget_bytes):
    """Fold rows into one grid step only when L_out is short (grid would otherwise be
    step-overhead dominated) and the folded, double-buffered x block stays small."""
    if n_lt > 1 or batch == 1 or l_out >= 512:
        return 1
    best = 1
    for cand in range(2, min(batch, 8) + 1):            # cap unroll at 8 rows/step
        if batch % cand:
            continue
        if cand * l_out > 2048:
            continue
        if 2 * cand * cin * length * x_itemsize > budget_bytes:
            continue
        best = cand
    return best


def _vmem_limit(need_bytes):
    try:
        cap = pltpu.get_tpu_info().vmem_capacity_bytes
    except Exception:                 # conservative fallback: assume v7x (64 MiB/TC)
        cap = 64 << 20
    # <= ~40 MiB on 64 MiB/TC chips (v7x); allow up to 96 MiB on 128 MiB chips.
    ceiling = (40 << 20) if cap <= (64 << 20) else (96 << 20)
    return int(min(max(need_bytes + (4 << 20), 16 << 20), ceiling))


# ---------------------------------------------------------------------------
# Wrapper.
# ---------------------------------------------------------------------------
def conv_block_forward(x_ncl, weight_oik, bias_o, *,
                       stride=1, padding=0, dilation=1, groups=1,
                       compute_dtype=jnp.bfloat16,
                       l_tile_target=1024,
                       halo_threshold_bytes=4 << 20):
    """ReLU(Conv1d(x)) for nn.Conv1d defaults (stride=1, padding=0, dilation=1, groups=1).

    x_ncl:      (B, Cin, L)      PyTorch NCL layout, consumed natively (no transposes)
    weight_oik: (Cout, Cin, K)   PyTorch Conv1d weight layout
    bias_o:     (Cout,)
    returns:    (B, Cout, L_out) with L_out = L - K + 1
    """
    if (stride, padding, dilation, groups) != (1, 0, 1, 1):
        raise NotImplementedError(
            "conv_block_forward: only the default nn.Conv1d hyper-parameters "
            "(stride=1, padding=0, dilation=1, groups=1) are implemented")

    B, Cin, L = x_ncl.shape
    Cout, Cin_w, K = weight_oik.shape
    assert Cin == Cin_w and bias_o.shape == (Cout,)
    L_out = L - K + 1
    assert L_out >= 1

    TL = _pick_l_tile(L_out, l_tile_target)
    n_lt = L_out // TL
    W = TL + K - 1

    out_dtype = x_ncl.dtype
    x_bytes = jnp.dtype(x_ncl.dtype).itemsize
    c_bytes = jnp.dtype(compute_dtype).itemsize
    o_bytes = jnp.dtype(out_dtype).itemsize

    # (Cout, Cin, K) -> (K, Cout, Cin): one clean (Cout, Cin) slab per tap.
    w_koc = jnp.transpose(weight_oik, (2, 0, 1)).astype(compute_dtype)
    b_col = bias_o.reshape(Cout, 1).astype(jnp.float32)

    # x goes in unchanged (native dtype); the compute-dtype cast is fused in-kernel.
    row_block_bytes = 2 * Cin * L * x_bytes              # double-buffered single row
    use_halo = (n_lt > 1) and (row_block_bytes > halo_threshold_bytes)

    cost = pl.CostEstimate(
        flops=2 * B * L_out * K * Cin * Cout,
        transcendentals=0,
        bytes_accessed=(B * Cin * L * x_bytes
                        + (B * (n_lt - 1) * (K - 1) * Cin * x_bytes if use_halo else 0)
                        + K * Cout * Cin * c_bytes + Cout * 4
                        + B * Cout * L_out * o_bytes),
    )

    w_spec = pl.BlockSpec((K, Cout, Cin), lambda b, lt: (0, 0, 0))
    b_spec = pl.BlockSpec((Cout, 1), lambda b, lt: (0, 0))

    if use_halo:
        kernel = functools.partial(_conv_relu_halo_kernel, ksize=K, tl=TL, n_lt=n_lt,
                                   compute_dtype=compute_dtype)
        need = (2 * Cin * W * x_bytes                    # halo scratch (two slots)
                + Cin * W * c_bytes                      # cast window temp
                + 2 * (K * Cout * Cin * c_bytes + Cout * 4)
                + 2 * Cout * TL * o_bytes                # out blocks (double-buffered)
                + Cout * TL * 4)                         # f32 accumulator
        grid_spec = pltpu.PrefetchScalarGridSpec(
            num_scalar_prefetch=0,
            grid=(B, n_lt),
            in_specs=[
                pl.BlockSpec(memory_space=pl.ANY),       # x stays in HBM; manual DMA
                w_spec, b_spec,
            ],
            out_specs=pl.BlockSpec((1, Cout, TL), lambda b, lt: (b, 0, lt)),
            scratch_shapes=[
                pltpu.VMEM((2, Cin, W), x_ncl.dtype),
                pltpu.SemaphoreType.DMA((2,)),
            ],
        )
        # L axis sequential (manual double-buffer carry); batch axis parallel
        # (TC sharding on v7x only; no-op on single-core v5e/v6e).
        dims = ("parallel", "arbitrary")
    else:
        BT = _pick_batch_tile(B, L_out, n_lt, Cin, L, x_bytes, halo_threshold_bytes)
        kernel = functools.partial(_conv_relu_rows_kernel, ksize=K, tl=TL, n_lt=n_lt,
                                   bt=BT, compute_dtype=compute_dtype)
        need = (2 * BT * Cin * L * x_bytes
                + 2 * (K * Cout * Cin * c_bytes + Cout * 4)
                + 2 * BT * Cout * TL * o_bytes
                + BT * Cin * W * c_bytes
                + BT * Cout * TL * 4)
        grid_spec = pltpu.PrefetchScalarGridSpec(
            num_scalar_prefetch=0,
            grid=(B // BT, n_lt),
            in_specs=[
                # Row-block index is constant across the inner L axis, so each group
                # of rows is DMA'd once and re-used for all of its L tiles.
                pl.BlockSpec((BT, Cin, L), lambda bb, lt: (bb, 0, 0)),
                w_spec, b_spec,
            ],
            out_specs=pl.BlockSpec((BT, Cout, TL), lambda bb, lt: (bb, 0, lt)),
        )
        dims = ("parallel", "parallel")

    return pl.pallas_call(
        kernel,
        out_shape=jax.ShapeDtypeStruct((B, Cout, L_out), out_dtype),
        grid_spec=grid_spec,
        compiler_params=pltpu.CompilerParams(
            dimension_semantics=dims,
            vmem_limit_bytes=_vmem_limit(need),
        ),
        cost_estimate=cost,
    )(x_ncl, w_koc, b_col)


# ---------------------------------------------------------------------------
# Pure-JAX reference: conv1d (valid, stride 1) + bias + ReLU, all f32.
# ---------------------------------------------------------------------------
def _reference(x_ncl, weight_oik, bias_o):
    out = jax.lax.conv_general_dilated(
        x_ncl, weight_oik,
        window_strides=(1,), padding="VALID",
        dimension_numbers=("NCH", "OIH", "NCH"),
    )
    out = out + bias_o[None, :, None]
    return jnp.maximum(out, 0.0)


if __name__ == "__main__":
    key = jax.random.PRNGKey(0)
    k1, k2, k3, k4, k5, k6 = jax.random.split(key, 6)

    # --- Test 1: tiny shapes -> resident-row path (path A) with batch folding ------
    B, Cin, Cout, L, K = 2, 4, 8, 16, 3
    x = jax.random.normal(k1, (B, Cin, L), dtype=jnp.float32)
    weight = jax.random.normal(k2, (Cout, Cin, K), dtype=jnp.float32) * 0.1
    bias = jax.random.normal(k3, (Cout,), dtype=jnp.float32) * 0.1
    ref = _reference(x, weight, bias)

    out_f32 = conv_block_forward(x, weight, bias, compute_dtype=jnp.float32)
    jax.block_until_ready(out_f32)
    assert out_f32.shape == (B, Cout, L - K + 1), out_f32.shape
    assert jnp.allclose(out_f32, ref, atol=1e-5, rtol=1e-5), "f32 mismatch (path A)"

    out_bf16 = conv_block_forward(x, weight, bias)       # default bf16 fast path
    jax.block_until_ready(out_bf16)
    assert out_bf16.shape == (B, Cout, L - K + 1), out_bf16.shape
    assert jnp.allclose(out_bf16, ref, atol=5e-2, rtol=5e-2), "bf16 mismatch (path A)"

    # --- Test 2: L-tiled manual halo-DMA path (path B), forced via threshold -------
    B2, Cin2, Cout2, K2 = 2, 8, 16, 5
    L_out2 = 512
    L2 = L_out2 + K2 - 1
    x2 = jax.random.normal(k4, (B2, Cin2, L2), dtype=jnp.float32)
    weight2 = jax.random.normal(k5, (Cout2, Cin2, K2), dtype=jnp.float32) * 0.1
    bias2 = jax.random.normal(k6, (Cout2,), dtype=jnp.float32) * 0.1
    ref2 = _reference(x2, weight2, bias2)

    out2 = conv_block_forward(x2, weight2, bias2, compute_dtype=jnp.float32,
                              l_tile_target=256, halo_threshold_bytes=0)
    jax.block_until_ready(out2)
    assert out2.shape == (B2, Cout2, L_out2), out2.shape
    assert jnp.allclose(out2, ref2, atol=1e-4, rtol=1e-4), "f32 mismatch (halo path)"

    print("KERNEL_OK")
</pallas_src>

<mosaic_0001>
module attributes {stable_mosaic.version = 11 : i64} {
  func.func @_conv_relu_rows_kernel(%arg0: i32, %arg1: i32, %arg2: memref<2x4x16xf32, #tpu.memory_space<vmem>>, %arg3: memref<3x8x4xf32, #tpu.memory_space<vmem>>, %arg4: memref<8x1xf32, #tpu.memory_space<vmem>>, %arg5: memref<2x8x14xf32, #tpu.memory_space<vmem>>) attributes {dimension_semantics = [#tpu.dimension_semantics<parallel>, #tpu.dimension_semantics<parallel>], iteration_bounds = array<i64: 1, 1>, scalar_prefetch = 0 : i64, scratch_operands = 0 : i64, tpu.core_type = #tpu.core_type<tc>, window_params = [{transform_indices = @transform_0, window_bounds = array<i64: 2, 4, 16>}, {pipeline_mode = #tpu.pipeline_mode<synchronous>, transform_indices = @transform_1, window_bounds = array<i64: 3, 8, 4>}, {pipeline_mode = #tpu.pipeline_mode<synchronous>, transform_indices = @transform_2, window_bounds = array<i64: 8, 1>}, {transform_indices = @transform_3, window_bounds = array<i64: 2, 8, 14>}]} {
    %c0 = arith.constant 0 : index
    %c0_0 = arith.constant 0 : index
    %c0_1 = arith.constant 0 : index
    %0 = vector.load %arg3[%c0, %c0_0, %c0_1] : memref<3x8x4xf32, #tpu.memory_space<vmem>>, vector<3x8x4xf32>
    %c0_2 = arith.constant 0 : index
    %c0_3 = arith.constant 0 : index
    %1 = vector.load %arg4[%c0_2, %c0_3] : memref<8x1xf32, #tpu.memory_space<vmem>>, vector<8x1xf32>
    %c0_4 = arith.constant 0 : index
    %c0_5 = arith.constant 0 : index
    %c0_6 = arith.constant 0 : index
    %2 = vector.load %arg2[%c0_4, %c0_5, %c0_6] : memref<2x4x16xf32, #tpu.memory_space<vmem>>, vector<1x4x16xf32>
    %3 = vector.shape_cast %2 : vector<1x4x16xf32> to vector<4x16xf32>
    %4 = vector.extract_strided_slice %0 {offsets = [0, 0, 0], sizes = [1, 8, 4], strides = [1, 1, 1]} : vector<3x8x4xf32> to vector<1x8x4xf32>
    %5 = vector.shape_cast %4 : vector<1x8x4xf32> to vector<8x4xf32>
    %6 = vector.extract_strided_slice %3 {offsets = [0, 0], sizes = [4, 14], strides = [1, 1]} : vector<4x16xf32> to vector<4x14xf32>
    %cst = arith.constant dense<0.000000e+00> : vector<8x14xf32>
    %7 = tpu.matmul %5, %6, %cst {dimension_numbers = #tpu.dot_dimension_numbers<[1], [0], [0], [1], [0, 0, 1, 1], [], []>} : vector<8x4xf32>, vector<4x14xf32>, vector<8x14xf32> -> vector<8x14xf32>
    %8 = vector.extract_strided_slice %0 {offsets = [1, 0, 0], sizes = [1, 8, 4], strides = [1, 1, 1]} : vector<3x8x4xf32> to vector<1x8x4xf32>
    %9 = vector.shape_cast %8 : vector<1x8x4xf32> to vector<8x4xf32>
    %10 = vector.extract_strided_slice %3 {offsets = [0, 1], sizes = [4, 14], strides = [1, 1]} : vector<4x16xf32> to vector<4x14xf32>
    %cst_7 = arith.constant dense<0.000000e+00> : vector<8x14xf32>
    %11 = tpu.matmul %9, %10, %cst_7 {dimension_numbers = #tpu.dot_dimension_numbers<[1], [0], [0], [1], [0, 0, 1, 1], [], []>} : vector<8x4xf32>, vector<4x14xf32>, vector<8x14xf32> -> vector<8x14xf32>
    %12 = arith.addf %7, %11 : vector<8x14xf32>
    %13 = vector.extract_strided_slice %0 {offsets = [2, 0, 0], sizes = [1, 8, 4], strides = [1, 1, 1]} : vector<3x8x4xf32> to vector<1x8x4xf32>
    %14 = vector.shape_cast %13 : vector<1x8x4xf32> to vector<8x4xf32>
    %15 = vector.extract_strided_slice %3 {offsets = [0, 2], sizes = [4, 14], strides = [1, 1]} : vector<4x16xf32> to vector<4x14xf32>
    %cst_8 = arith.constant dense<0.000000e+00> : vector<8x14xf32>
    %16 = tpu.matmul %14, %15, %cst_8 {dimension_numbers = #tpu.dot_dimension_numbers<[1], [0], [0], [1], [0, 0, 1, 1], [], []>} : vector<8x4xf32>, vector<4x14xf32>, vector<8x14xf32> -> vector<8x14xf32>
    %17 = arith.addf %12, %16 : vector<8x14xf32>
    %18 = vector.broadcast %1 : vector<8x1xf32> to vector<8x14xf32>
    %19 = arith.addf %17, %18 : vector<8x14xf32>
    %cst_9 = arith.constant 0.000000e+00 : f32
    %20 = vector.broadcast %cst_9 : f32 to vector<8x14xf32>
    %21 = arith.maximumf %19, %20 : vector<8x14xf32>
    %c0_10 = arith.constant 0 : index
    %c0_11 = arith.constant 0 : index
    %c0_12 = arith.constant 0 : index
    %22 = vector.load %arg5[%c0_10, %c0_11, %c0_12] : memref<2x8x14xf32, #tpu.memory_space<vmem>>, vector<1x8x14xf32>
    %23 = vector.shape_cast %22 : vector<1x8x14xf32> to vector<8x14xf32>
    %24 = vector.shape_cast %21 : vector<8x14xf32> to vector<1x8x14xf32>
    tpu.vector_store %arg5[%c0_10, %c0_11, %c0_12], %24 {strides = array<i32>} : memref<2x8x14xf32, #tpu.memory_space<vmem>>, vector<1x8x14xf32>,
    %c1 = arith.constant 1 : index
    %c0_13 = arith.constant 0 : index
    %c0_14 = arith.constant 0 : index
    %25 = vector.load %arg2[%c1, %c0_13, %c0_14] : memref<2x4x16xf32, #tpu.memory_space<vmem>>, vector<1x4x16xf32>
    %26 = vector.shape_cast %25 : vector<1x4x16xf32> to vector<4x16xf32>
    %27 = vector.extract_strided_slice %0 {offsets = [0, 0, 0], sizes = [1, 8, 4], strides = [1, 1, 1]} : vector<3x8x4xf32> to vector<1x8x4xf32>
    %28 = vector.shape_cast %27 : vector<1x8x4xf32> to vector<8x4xf32>
    %29 = vector.extract_strided_slice %26 {offsets = [0, 0], sizes = [4, 14], strides = [1, 1]} : vector<4x16xf32> to vector<4x14xf32>
    %cst_15 = arith.constant dense<0.000000e+00> : vector<8x14xf32>
    %30 = tpu.matmul %28, %29, %cst_15 {dimension_numbers = #tpu.dot_dimension_numbers<[1], [0], [0], [1], [0, 0, 1, 1], [], []>} : vector<8x4xf32>, vector<4x14xf32>, vector<8x14xf32> -> vector<8x14xf32>
    %31 = vector.extract_strided_slice %0 {offsets = [1, 0, 0], sizes = [1, 8, 4], strides = [1, 1, 1]} : vector<3x8x4xf32> to vector<1x8x4xf32>
    %32 = vector.shape_cast %31 : vector<1x8x4xf32> to vector<8x4xf32>
    %33 = vector.extract_strided_slice %26 {offsets = [0, 1], sizes = [4, 14], strides = [1, 1]} : vector<4x16xf32> to vector<4x14xf32>
    %cst_16 = arith.constant dense<0.000000e+00> : vector<8x14xf32>
    %34 = tpu.matmul %32, %33, %cst_16 {dimension_numbers = #tpu.dot_dimension_numbers<[1], [0], [0], [1], [0, 0, 1, 1], [], []>} : vector<8x4xf32>, vector<4x14xf32>, vector<8x14xf32> -> vector<8x14xf32>
    %35 = arith.addf %30, %34 : vector<8x14xf32>
    %36 = vector.extract_strided_slice %0 {offsets = [2, 0, 0], sizes = [1, 8, 4], strides = [1, 1, 1]} : vector<3x8x4xf32> to vector<1x8x4xf32>
    %37 = vector.shape_cast %36 : vector<1x8x4xf32> to vector<8x4xf32>
    %38 = vector.extract_strided_slice %26 {offsets = [0, 2], sizes = [4, 14], strides = [1, 1]} : vector<4x16xf32> to vector<4x14xf32>
    %cst_17 = arith.constant dense<0.000000e+00> : vector<8x14xf32>
    %39 = tpu.matmul %37, %38, %cst_17 {dimension_numbers = #tpu.dot_dimension_numbers<[1], [0], [0], [1], [0, 0, 1, 1], [], []>} : vector<8x4xf32>, vector<4x14xf32>, vector<8x14xf32> -> vector<8x14xf32>
    %40 = arith.addf %35, %39 : vector<8x14xf32>
    %41 = vector.broadcast %1 : vector<8x1xf32> to vector<8x14xf32>
    %42 = arith.addf %40, %41 : vector<8x14xf32>
    %cst_18 = arith.constant 0.000000e+00 : f32
    %43 = vector.broadcast %cst_18 : f32 to vector<8x14xf32>
    %44 = arith.maximumf %42, %43 : vector<8x14xf32>
    %c1_19 = arith.constant 1 : index
    %c0_20 = arith.constant 0 : index
    %c0_21 = arith.constant 0 : index
    %45 = vector.load %arg5[%c1_19, %c0_20, %c0_21] : memref<2x8x14xf32, #tpu.memory_space<vmem>>, vector<1x8x14xf32>
    %46 = vector.shape_cast %45 : vector<1x8x14xf32> to vector<8x14xf32>
    %47 = vector.shape_cast %44 : vector<8x14xf32> to vector<1x8x14xf32>
    tpu.vector_store %arg5[%c1_19, %c0_20, %c0_21], %47 {strides = array<i32>} : memref<2x8x14xf32, #tpu.memory_space<vmem>>, vector<1x8x14xf32>,
    return
  }
  func.func @transform_0(%arg0: i32, %arg1: i32) -> (i32, i32, i32) {
    %c0_i32 = arith.constant 0 : i32
    %c0_i32_0 = arith.constant 0 : i32
    %c0_i32_1 = arith.constant 0 : i32
    return %arg0, %c0_i32, %c0_i32_0 : i32, i32, i32
  }
  func.func @transform_1(%arg0: i32, %arg1: i32) -> (i32, i32, i32) {
    %c0_i32 = arith.constant 0 : i32
    %c0_i32_0 = arith.constant 0 : i32
    %c0_i32_1 = arith.constant 0 : i32
    %c0_i32_2 = arith.constant 0 : i32
    return %c0_i32, %c0_i32_0, %c0_i32_1 : i32, i32, i32
  }
  func.func @transform_2(%arg0: i32, %arg1: i32) -> (i32, i32) {
    %c0_i32 = arith.constant 0 : i32
    %c0_i32_0 = arith.constant 0 : i32
    %c0_i32_1 = arith.constant 0 : i32
    return %c0_i32, %c0_i32_0 : i32, i32
  }
  func.func @transform_3(%arg0: i32, %arg1: i32) -> (i32, i32, i32) {
    %c0_i32 = arith.constant 0 : i32
    %c0_i32_0 = arith.constant 0 : i32
    return %arg0, %c0_i32, %arg1 : i32, i32, i32
  }
}

</mosaic_0001>

<bundles_post_ra>
// kernel: tpu_custom_call.1
= control target key start
LH: loop header
LB: loop body
LE: loop exit
PB: predicated region body
PF: predicated region fallthrough
CT: control target
= control target key end

     0   :  { %s592_s16 = smov 127   ;;  %vm27_vm0 = vcmask 1043456   ;;  %v593_v2 = vmov 0.0   ;;  %vm594_vm1 = vmmov 0   ;;  %s659_s0 = inlined_call_operand.vmem [shape: f32[2,4,16], index: 0, kind: input, shape index: {}]   ;;  %s660_s1 = inlined_call_operand.vmem [shape: f32[3,8,4], index: 1, kind: input, shape index: {}]   ;;  %s661_s2 = inlined_call_operand.vmem [shape: f32[8,1], index: 2, kind: input, shape index: {}]   ;;  %s662_s3 = inlined_call_operand.hbm [shape: f32[2,8,14], index: 3, kind: output, shape index: {}]  }
   0x1   :  { %v19_v0 = vld [vmem:[%s659_s0] sm:$0xf]  ;;  %v512_v1 = vld [vmem:[%s659_s0 + $0x4] sm:$0xf]  ;;  %531 = vmatprep.subr.mxu0 %v593_v2  ;;  %533 = vmatprep.mubr.msk.f32.mxu0 %vm594_vm1, %v593_v2 }
   0x2   :  { %21 = vrot.lane.b32.xlu0 %v19_v0, %s592_s16  ;;  %265 = vrot.lane.b32.xlu1 %v512_v1, %s592_s16 }
   0x3   :  { %8 = vsyncpa [#allocation3], 0  ;;  %vm23_vm2 = vcmask 31744   ;;  %536 = vmatprep.subr.mxu1 %v593_v2  ;;  %538 = vmatprep.mubr.msk.f32.mxu1 %vm594_vm1, %v593_v2  ;;  %v15_v3 = vld [vmem:[%s660_s1] sm:$0xff]  ;;  %v595_v4 = vmov 0   ;;  %s596_s0 = smov 126  }
   0x4   :  { %537 = vmatpush3.msk.msra.mxu1 %vm27_vm0, %v19_v0  ;;  %569 = vset.pattern.permute.xlu0 %v595_v4  ;;  %v18_v5 = vld [vmem:[%s661_s2] sm:$0xff]  ;;  %v16_v6 = vld [vmem:[%s660_s1 + $0x8] sm:$0xff]  ;;  %v17_v9 = vld [vmem:[%s660_s1 + $0x10] sm:$0xff]  ;;  %vm260_vm3 = vcmask 113664   ;;  %s597_s1 = smov [#allocation2]  }
   0x5   :  { %539 = vmatmul.mubr.msk.f32.vlgmr.msra.gmra.mxu1 %vm23_vm2, %v15_v3  ;;  %546 = vmatprep.subr.mxu1 %v593_v2  ;;  %s495_s24 = sshll.u32 %s597_s1, 4  ;;  %s496_s24 = int_to_ptr.vmem [resolvable:$true] %s495_s24 }
   0x6   :  { %175 = vrot.lane.b32.xlu0 %v19_v0, %s596_s0  ;;  %411 = vrot.lane.b32.xlu1 %v512_v1, %s596_s0  ;;  %s570_s25 = scalar_lea.vmem %s496_s24, 256  ;;  %p575_p1 = scmp.lt.s32.totalorder %s496_s24, %s496_s24 }
   0x7   :  { %548 = vmatprep.mubr.msk.f32.mxu1 %vm594_vm1, %v593_v2  ;;  %p571_p0 = scmp.ne.s32.totalorder %s496_s24, %s570_s25  ;;  %p576_p2 = scmp.lt.s32.totalorder %s570_s25, %s570_s25 }
   0x9   :  { %p577_p3 = por %p576_p2, %p575_p1 }
   0xa   :  { %255 = vperm.xlu0 %569, %v18_v5  }
   0xb   :  { %p578_p4 = pnand %p577_p3, %p571_p0 }
  0x74   :  { %v22_v7 = vpop.permute.xlu0 %21  ;;  %v266_v8 = vpop.permute.xlu1 %265 }
  0x75   :  { %532 = vmatpush3.msk.msra.mxu0 %vm27_vm0, %v22_v7  ;;  %547 = vmatpush3.msk.msra.mxu1 %vm27_vm0, %v266_v8 }
  0x76   :  { %534 = vmatmul.mubr.msk.f32.vlgmr.msra.gmra.mxu0 %vm23_vm2, %v16_v6  ;;  %541 = vmatprep.subr.mxu0 %v593_v2 }
  0x77   :  { %543 = vmatprep.mubr.msk.f32.mxu0 %vm594_vm1, %v593_v2  ;;  %549 = vmatmul.mubr.msk.f32.vlgmr.msra.gmra.mxu1 %vm23_vm2, %v16_v6 }
  0x78   :  { %v176_v10 = vpop.permute.xlu0 %175  ;;  %v412_v11 = vpop.permute.xlu1 %411  ;;  %556 = vmatprep.subr.mxu1 %v593_v2  ;;  %558 = vmatprep.mubr.msk.f32.mxu1 %vm594_vm1, %v593_v2 }
  0x79   :  { %542 = vmatpush3.msk.msra.mxu0 %vm27_vm0, %v176_v10  ;;  %557 = vmatpush3.msk.msra.mxu1 %vm27_vm0, %v412_v11 }
  0x7a   :  { %544 = vmatmul.mubr.msk.f32.vlgmr.msra.gmra.mxu0 %vm23_vm2, %v17_v9  ;;  %551 = vmatprep.subr.mxu0 %v593_v2 }
  0x7b   :  { %552 = vmatpush3.msk.msra.mxu0 %vm27_vm0, %v512_v1  ;;  %553 = vmatprep.mubr.msk.f32.mxu0 %vm594_vm1, %v593_v2 }
  0x7c   :  { %559 = vmatmul.mubr.msk.f32.vlgmr.msra.gmra.mxu1 %vm23_vm2, %v17_v9 }
  0x7e   :  { %554 = vmatmul.mubr.msk.f32.vlgmr.msra.gmra.mxu0 %vm23_vm2, %v15_v3 }
  0x85   :  { %v256_v20 = vpop.permute.xlu0 %255 }
  0xc5   :  { %v171_v12 = vpop.f32.mrf.mxu1 }
  0xc7   :  { %v540_v13 = vpop.f32.mrf.mxu1 }
 0x136   :  { %v96_v14 = vpop.f32.mrf.mxu0 }
 0x137   :  { %v335_v15 = vpop.f32.mrf.mxu1  ;;  %v172_v17 = vadd.f32 %v171_v12, %v96_v14 }
 0x138   :  { %v535_v16 = vpop.f32.mrf.mxu0 }
 0x139   :  { %v550_v18 = vpop.f32.mrf.mxu1 }
 0x13a   :  { %v248_v19 = vpop.f32.mrf.mxu0 }
 0x13b   :  { %v252_v21 = vadd.f32 %v248_v19, %v172_v17 }
 0x13c   :  { %v545_v22 = vpop.f32.mrf.mxu0  ;;  %v481_v23 = vpop.f32.mrf.mxu1 }
 0x13d   :  { %v258_v24 = vadd.f32 %v256_v20, %v252_v21 }
 0x13e   :  { %v407_v25 = vpop.f32.mrf.mxu0  ;;  %v560_v26 = vpop.f32.mrf.mxu1 }
 0x13f   :  { %v259_v27 = vmax.f32 %v258_v24, 0.0  ;;  %v408_v28 = vadd.f32 %v407_v25, %v335_v15 }
 0x140   :  { %v555_v29 = vpop.f32.mrf.mxu0 }
 0x141   :  { %261 = vst.msk [vmem:[#allocation2] sm:$0xff] %vm260_vm3, %v259_v27  ;;  %v485_v30 = vadd.f32 %v481_v23, %v408_v28 }
 0x143   :  { %v486_v31 = vadd.f32 %v485_v30, %v256_v20 }
 0x145   :  { %v487_v32 = vmax.f32 %v486_v31, 0.0 }
 0x147   :  { %489 = vst.msk [vmem:[#allocation2 + $0x8] sm:$0xff] %vm260_vm3, %v487_v32 }
 0x148   :  { %581 = shalt.err (!%p578_p4)
}
 0x149   :  { %s598_s26 = smov 128   ;;  %s599_s27 = smov 8  }
 0x14a   :  { %501 = dma.vmem_to_hbm [thread:$0]  %s496_s24, 256, %s662_s3, [#allocation3], %s598_s26, %s598_s26, %s599_s27  }
 0x14b   :  { %590 = dma.done.wait [#allocation3], 256  }
 0x14c   :  { %591 = vsyncadd [#allocation3], 4294967040 }
 0x14d   :  { %505 = vsyncpa [#allocation3], 1 }

</bundles_post_ra>
